<compile_context>
chip_gen: v7x
topology: tpu7x:2x2x1
jax: 0.10.0
libtpu: 0.0.40
codegen_flags: <defaults>
</compile_context>

<pallas_src>
import math

import jax
import jax.numpy as jnp
from jax.experimental import pallas as pl
from jax.experimental.pallas import tpu as pltpu


_SUBLANE = 8                    # f32 sublane height: batch rows padded to this
_WEIGHT_DTYPE = jnp.bfloat16    # storage/DMA/MXU-operand dtype for weights


def _round_up(x, m):
    return (x + m - 1) // m * m


# ----------------------------------------------------------------------------
# Fused kernel: num_layers LSTM cells + output Linear, single invocation.
# ----------------------------------------------------------------------------
def _make_fused_kernel(num_layers, hidden_size):
    H = hidden_size

    def kernel(*refs):
        # refs = (x, h0, c0, [w_ih, w_hh, b]*L, w_out, b_out, pred, h_out, c_out)
        x_ref, h0_ref, c0_ref = refs[0], refs[1], refs[2]
        lw = refs[3:3 + 3 * num_layers]
        w_out_ref = refs[3 + 3 * num_layers]
        b_out_ref = refs[4 + 3 * num_layers]
        pred_ref, h_out_ref, c_out_ref = refs[5 + 3 * num_layers:]

        x_l = x_ref[...]                          # (b_pad, in_sz) bf16
        for layer in range(num_layers):           # static unroll
            w_ih = lw[3 * layer][...]             # (in_sz, 4H) bf16
            w_hh = lw[3 * layer + 1][...]         # (H,     4H) bf16
            b = lw[3 * layer + 2][...]            # (1,     4H) f32
            h = h0_ref[layer]                     # (b_pad, H)  f32
            c = c0_ref[layer]                     # (b_pad, H)  f32

            # bf16 x bf16 -> f32 accumulate: native full-rate MXU on all gens.
            gates = (jnp.dot(x_l, w_ih, preferred_element_type=jnp.float32)
                     + jnp.dot(h.astype(jnp.bfloat16), w_hh,
                               preferred_element_type=jnp.float32)
                     + b)                         # (b_pad, 4H) f32, packed i|f|g|o

            # One sigmoid pass over the packed gate vreg covers i, f and o;
            # gate extraction is static lane slices (4*H == 128 -> one vreg).
            sig = jax.nn.sigmoid(gates)
            i_g = sig[:, 0 * H:1 * H]
            f_g = sig[:, 1 * H:2 * H]
            o_g = sig[:, 3 * H:4 * H]
            g_g = jnp.tanh(gates[:, 2 * H:3 * H])

            c_new = f_g * c + i_g * g_g           # f32 elementwise
            h_new = o_g * jnp.tanh(c_new)

            h_out_ref[layer] = h_new
            c_out_ref[layer] = c_new
            x_l = h_new.astype(jnp.bfloat16)      # inter-layer dropout == 0

        # Output head: y = h_last @ W_out^T + b_out.
        pred_ref[...] = (jnp.dot(x_l, w_out_ref[...],
                                 preferred_element_type=jnp.float32)
                         + b_out_ref[...])

    return kernel


# ----------------------------------------------------------------------------
# Parameters (PyTorch nn.LSTM / nn.Linear layout) + packing into kernel layout.
# ----------------------------------------------------------------------------
def init_params(key, input_size, hidden_size, output_size, num_layers=1,
                weight_dtype=_WEIGHT_DTYPE):
    """Deterministic params with nn.LSTM/nn.Linear shapes (gate order i,f,g,o)."""
    k = 1.0 / math.sqrt(hidden_size)
    layers = []
    for layer in range(num_layers):
        in_sz = input_size if layer == 0 else hidden_size
        key, k1, k2, k3, k4 = jax.random.split(key, 5)
        w_ih = jax.random.uniform(k1, (4 * hidden_size, in_sz), jnp.float32, -k, k)
        w_hh = jax.random.uniform(k2, (4 * hidden_size, hidden_size), jnp.float32, -k, k)
        b_ih = jax.random.uniform(k3, (4 * hidden_size,), jnp.float32, -k, k)
        b_hh = jax.random.uniform(k4, (4 * hidden_size,), jnp.float32, -k, k)
        layers.append({"w_ih": w_ih.astype(weight_dtype),
                       "w_hh": w_hh.astype(weight_dtype),
                       "b_ih": b_ih, "b_hh": b_hh})
    key, k5, k6 = jax.random.split(key, 3)
    w_out = jax.random.uniform(k5, (output_size, hidden_size), jnp.float32, -k, k)
    b_out = jax.random.uniform(k6, (output_size,), jnp.float32, -k, k)
    return {"layers": layers,
            "w_out": w_out.astype(weight_dtype),
            "b_out": b_out}


def pack_params(params):
    """Kernel layout: per layer (W_ih^T (in_sz,4H) bf16, W_hh^T (H,4H) bf16,
    folded bias (1,4H) f32); output head (H,out) bf16 + (1,out) f32.
    PyTorch's row order is already i|f|g|o, so transposition is all we need —
    the gate (N) axis stays tightly packed (no per-gate 128-lane padding)."""
    packed_layers = []
    for p in params["layers"]:
        w_ih = p["w_ih"].T                                   # (in_sz, 4H) bf16
        w_hh = p["w_hh"].T                                   # (H,     4H) bf16
        b = (p["b_ih"] + p["b_hh"]).astype(jnp.float32)[None, :]
        packed_layers.append((w_ih, w_hh, b))
    w_out = params["w_out"].T                                # (H, out) bf16
    b_out = params["b_out"].astype(jnp.float32)[None, :]     # (1, out) f32
    return {"layers": packed_layers, "w_out": w_out, "b_out": b_out}


# ----------------------------------------------------------------------------
# Forward pass factory (mirrors LSTMDecoder.forward)
# ----------------------------------------------------------------------------
def make_lstm_decoder(input_size, hidden_size, output_size, num_layers=1):
    kernel = _make_fused_kernel(num_layers, hidden_size)
    vmem_spec = pl.BlockSpec(memory_space=pltpu.MemorySpace.VMEM)

    def forward(x, h0, c0, packed):
        """x: (B, 1, input_size); h0/c0: (num_layers, B, hidden_size).
        Returns (pred (B, 1, output_size), (h_new, c_new))."""
        B = x.shape[0]
        b_pad = _round_up(B, _SUBLANE)

        # Only the batch dim is padded (feature dims stay tight).
        x_p = jnp.zeros((b_pad, input_size), jnp.bfloat16).at[:B].set(
            x[:, 0, :].astype(jnp.bfloat16))
        h0_p = jnp.zeros((num_layers, b_pad, hidden_size), jnp.float32).at[
            :, :B].set(h0.astype(jnp.float32))
        c0_p = jnp.zeros((num_layers, b_pad, hidden_size), jnp.float32).at[
            :, :B].set(c0.astype(jnp.float32))

        inputs = [x_p, h0_p, c0_p]
        for (w_ih, w_hh, b) in packed["layers"]:
            inputs += [w_ih, w_hh, b]
        inputs += [packed["w_out"], packed["b_out"]]

        # Advisory cost estimate for the XLA scheduler.
        flops = 2 * b_pad * hidden_size * output_size
        transcendentals = 0
        for layer in range(num_layers):
            in_sz = input_size if layer == 0 else hidden_size
            flops += 2 * b_pad * (in_sz + hidden_size) * 4 * hidden_size
            transcendentals += b_pad * 6 * hidden_size   # sigmoid(4H)+tanh(H)+tanh(H)
        bytes_accessed = sum(int(a.size) * a.dtype.itemsize for a in inputs)
        bytes_accessed += 4 * (b_pad * output_size
                               + 2 * num_layers * b_pad * hidden_size)

        pred_p, h_p, c_p = pl.pallas_call(
            kernel,
            out_shape=(
                jax.ShapeDtypeStruct((b_pad, output_size), jnp.float32),
                jax.ShapeDtypeStruct((num_layers, b_pad, hidden_size), jnp.float32),
                jax.ShapeDtypeStruct((num_layers, b_pad, hidden_size), jnp.float32),
            ),
            in_specs=[vmem_spec] * len(inputs),
            out_specs=(vmem_spec, vmem_spec, vmem_spec),
            # h/c state buffers are updated in place (becomes a true in-place
            # update once padded state is kept resident across decode steps).
            input_output_aliases={1: 1, 2: 2},
            cost_estimate=pl.CostEstimate(flops=flops,
                                          transcendentals=transcendentals,
                                          bytes_accessed=bytes_accessed),
        )(*inputs)

        pred = pred_p[:B][:, None, :]
        h_new = h_p[:, :B, :]
        c_new = c_p[:, :B, :]
        return pred, (h_new, c_new)

    return jax.jit(forward)


# ----------------------------------------------------------------------------
# Pure-JAX reference with identical numerics (bf16 weights & MXU operands,
# f32 accumulation and elementwise) -> tight tolerance comparison.
# ----------------------------------------------------------------------------
def reference_forward(x, h0, c0, params):
    layer_in = x[:, 0, :].astype(jnp.bfloat16)
    H = h0.shape[-1]
    h_list, c_list = [], []
    for layer, p in enumerate(params["layers"]):
        b = (p["b_ih"] + p["b_hh"]).astype(jnp.float32)
        h = h0[layer].astype(jnp.float32)
        c = c0[layer].astype(jnp.float32)
        gates = (jnp.dot(layer_in, p["w_ih"].T, preferred_element_type=jnp.float32)
                 + jnp.dot(h.astype(jnp.bfloat16), p["w_hh"].T,
                           preferred_element_type=jnp.float32)
                 + b[None, :])
        i = jax.nn.sigmoid(gates[:, 0 * H:1 * H])
        f = jax.nn.sigmoid(gates[:, 1 * H:2 * H])
        g = jnp.tanh(gates[:, 2 * H:3 * H])
        o = jax.nn.sigmoid(gates[:, 3 * H:4 * H])
        c_new = f * c + i * g
        h_new = o * jnp.tanh(c_new)
        h_list.append(h_new)
        c_list.append(c_new)
        layer_in = h_new.astype(jnp.bfloat16)
    pred = (jnp.dot(layer_in, params["w_out"].T, preferred_element_type=jnp.float32)
            + params["b_out"][None, :])
    return pred[:, None, :], (jnp.stack(h_list), jnp.stack(c_list))


if __name__ == "__main__":
    batch = 2
    input_size = 16
    hidden_size = 32
    output_size = 8

    for num_layers in (1, 2):   # exercise single-layer and fused multi-layer
        root = jax.random.PRNGKey(0)
        k_param, k_x, k_h, k_c = jax.random.split(root, 4)

        params = init_params(k_param, input_size, hidden_size, output_size, num_layers)
        packed = pack_params(params)
        forward = make_lstm_decoder(input_size, hidden_size, output_size, num_layers)

        x = jax.random.normal(k_x, (batch, 1, input_size), jnp.float32)
        h0 = jax.random.normal(k_h, (num_layers, batch, hidden_size), jnp.float32)
        c0 = jax.random.normal(k_c, (num_layers, batch, hidden_size), jnp.float32)

        pred, (h_new, c_new) = forward(x, h0, c0, packed)
        jax.block_until_ready((pred, h_new, c_new))

        ref_pred, (ref_h, ref_c) = reference_forward(x, h0, c0, params)
        assert pred.shape == (batch, 1, output_size)
        assert h_new.shape == (num_layers, batch, hidden_size)
        assert c_new.shape == (num_layers, batch, hidden_size)
        assert jnp.allclose(pred, ref_pred, atol=1e-3, rtol=1e-3)
        assert jnp.allclose(h_new, ref_h, atol=1e-3, rtol=1e-3)
        assert jnp.allclose(c_new, ref_c, atol=1e-3, rtol=1e-3)

    print("KERNEL_OK")
</pallas_src>

<mosaic_0001>
module attributes {stable_mosaic.version = 11 : i64} {
  func.func @kernel(%arg0: memref<8x16xbf16, #tpu.memory_space<vmem>>, %arg1: memref<1x8x32xf32, #tpu.memory_space<vmem>>, %arg2: memref<1x8x32xf32, #tpu.memory_space<vmem>>, %arg3: memref<16x128xbf16, #tpu.memory_space<vmem>>, %arg4: memref<32x128xbf16, #tpu.memory_space<vmem>>, %arg5: memref<1x128xf32, #tpu.memory_space<vmem>>, %arg6: memref<32x8xbf16, #tpu.memory_space<vmem>>, %arg7: memref<1x8xf32, #tpu.memory_space<vmem>>, %arg8: memref<8x8xf32, #tpu.memory_space<vmem>>, %arg9: memref<1x8x32xf32, #tpu.memory_space<vmem>>, %arg10: memref<1x8x32xf32, #tpu.memory_space<vmem>>) attributes {dimension_semantics = [], scalar_prefetch = 0 : i64, scratch_operands = 0 : i64, tpu.core_type = #tpu.core_type<tc>} {
    %c0 = arith.constant 0 : index
    %c0_0 = arith.constant 0 : index
    %0 = vector.load %arg0[%c0, %c0_0] : memref<8x16xbf16, #tpu.memory_space<vmem>>, vector<8x16xbf16>
    %c0_1 = arith.constant 0 : index
    %c0_2 = arith.constant 0 : index
    %1 = vector.load %arg3[%c0_1, %c0_2] : memref<16x128xbf16, #tpu.memory_space<vmem>>, vector<16x128xbf16>
    %c0_3 = arith.constant 0 : index
    %c0_4 = arith.constant 0 : index
    %2 = vector.load %arg4[%c0_3, %c0_4] : memref<32x128xbf16, #tpu.memory_space<vmem>>, vector<32x128xbf16>
    %c0_5 = arith.constant 0 : index
    %c0_6 = arith.constant 0 : index
    %3 = vector.load %arg5[%c0_5, %c0_6] : memref<1x128xf32, #tpu.memory_space<vmem>>, vector<1x128xf32>
    %c0_7 = arith.constant 0 : index
    %c0_8 = arith.constant 0 : index
    %c0_9 = arith.constant 0 : index
    %4 = vector.load %arg1[%c0_7, %c0_8, %c0_9] : memref<1x8x32xf32, #tpu.memory_space<vmem>>, vector<1x8x32xf32>
    %5 = vector.shape_cast %4 : vector<1x8x32xf32> to vector<8x32xf32>
    %c0_10 = arith.constant 0 : index
    %c0_11 = arith.constant 0 : index
    %c0_12 = arith.constant 0 : index
    %6 = vector.load %arg2[%c0_10, %c0_11, %c0_12] : memref<1x8x32xf32, #tpu.memory_space<vmem>>, vector<1x8x32xf32>
    %7 = vector.shape_cast %6 : vector<1x8x32xf32> to vector<8x32xf32>
    %cst = arith.constant dense<0.000000e+00> : vector<8x128xf32>
    %8 = tpu.matmul %0, %1, %cst {dimension_numbers = #tpu.dot_dimension_numbers<[1], [0], [0], [1], [0, 0, 1, 1], [], []>} : vector<8x16xbf16>, vector<16x128xbf16>, vector<8x128xf32> -> vector<8x128xf32>
    %9 = arith.truncf %5 : vector<8x32xf32> to vector<8x32xbf16>
    %cst_13 = arith.constant dense<0.000000e+00> : vector<8x128xf32>
    %10 = tpu.matmul %9, %2, %cst_13 {dimension_numbers = #tpu.dot_dimension_numbers<[1], [0], [0], [1], [0, 0, 1, 1], [], []>} : vector<8x32xbf16>, vector<32x128xbf16>, vector<8x128xf32> -> vector<8x128xf32>
    %11 = arith.addf %8, %10 : vector<8x128xf32>
    %12 = vector.broadcast %3 : vector<1x128xf32> to vector<8x128xf32>
    %13 = arith.addf %11, %12 : vector<8x128xf32>
    %14 = arith.negf %13 : vector<8x128xf32>
    %15 = math.exp %14 : vector<8x128xf32>
    %cst_14 = arith.constant 1.000000e+00 : f32
    %16 = vector.broadcast %cst_14 : f32 to vector<8x128xf32>
    %17 = arith.addf %16, %15 : vector<8x128xf32>
    %18 = arith.divf %16, %17 : vector<8x128xf32>
    %19 = vector.extract_strided_slice %18 {offsets = [0, 0], sizes = [8, 32], strides = [1, 1]} : vector<8x128xf32> to vector<8x32xf32>
    %20 = vector.extract_strided_slice %18 {offsets = [0, 32], sizes = [8, 32], strides = [1, 1]} : vector<8x128xf32> to vector<8x32xf32>
    %21 = vector.extract_strided_slice %18 {offsets = [0, 96], sizes = [8, 32], strides = [1, 1]} : vector<8x128xf32> to vector<8x32xf32>
    %22 = vector.extract_strided_slice %13 {offsets = [0, 64], sizes = [8, 32], strides = [1, 1]} : vector<8x128xf32> to vector<8x32xf32>
    %23 = math.tanh %22 : vector<8x32xf32>
    %24 = arith.mulf %20, %7 : vector<8x32xf32>
    %25 = arith.mulf %19, %23 : vector<8x32xf32>
    %26 = arith.addf %24, %25 : vector<8x32xf32>
    %27 = math.tanh %26 : vector<8x32xf32>
    %28 = arith.mulf %21, %27 : vector<8x32xf32>
    %c0_15 = arith.constant 0 : index
    %c0_16 = arith.constant 0 : index
    %c0_17 = arith.constant 0 : index
    %29 = vector.load %arg9[%c0_15, %c0_16, %c0_17] : memref<1x8x32xf32, #tpu.memory_space<vmem>>, vector<1x8x32xf32>
    %30 = vector.shape_cast %29 : vector<1x8x32xf32> to vector<8x32xf32>
    %31 = vector.shape_cast %28 : vector<8x32xf32> to vector<1x8x32xf32>
    tpu.vector_store %arg9[%c0_15, %c0_16, %c0_17], %31 {strides = array<i32>} : memref<1x8x32xf32, #tpu.memory_space<vmem>>, vector<1x8x32xf32>,
    %c0_18 = arith.constant 0 : index
    %c0_19 = arith.constant 0 : index
    %c0_20 = arith.constant 0 : index
    %32 = vector.load %arg10[%c0_18, %c0_19, %c0_20] : memref<1x8x32xf32, #tpu.memory_space<vmem>>, vector<1x8x32xf32>
    %33 = vector.shape_cast %32 : vector<1x8x32xf32> to vector<8x32xf32>
    %34 = vector.shape_cast %26 : vector<8x32xf32> to vector<1x8x32xf32>
    tpu.vector_store %arg10[%c0_18, %c0_19, %c0_20], %34 {strides = array<i32>} : memref<1x8x32xf32, #tpu.memory_space<vmem>>, vector<1x8x32xf32>,
    %35 = arith.truncf %28 : vector<8x32xf32> to vector<8x32xbf16>
    %c0_21 = arith.constant 0 : index
    %c0_22 = arith.constant 0 : index
    %36 = vector.load %arg6[%c0_21, %c0_22] : memref<32x8xbf16, #tpu.memory_space<vmem>>, vector<32x8xbf16>
    %cst_23 = arith.constant dense<0.000000e+00> : vector<8x8xf32>
    %37 = tpu.matmul %35, %36, %cst_23 {dimension_numbers = #tpu.dot_dimension_numbers<[1], [0], [0], [1], [0, 0, 1, 1], [], []>} : vector<8x32xbf16>, vector<32x8xbf16>, vector<8x8xf32> -> vector<8x8xf32>
    %c0_24 = arith.constant 0 : index
    %c0_25 = arith.constant 0 : index
    %38 = vector.load %arg7[%c0_24, %c0_25] : memref<1x8xf32, #tpu.memory_space<vmem>>, vector<1x8xf32>
    %39 = vector.broadcast %38 : vector<1x8xf32> to vector<8x8xf32>
    %40 = arith.addf %37, %39 : vector<8x8xf32>
    %c0_26 = arith.constant 0 : index
    %c0_27 = arith.constant 0 : index
    %41 = vector.load %arg8[%c0_26, %c0_27] : memref<8x8xf32, #tpu.memory_space<vmem>>, vector<8x8xf32>
    tpu.vector_store %arg8[%c0_26, %c0_27], %40 {strides = array<i32>} : memref<8x8xf32, #tpu.memory_space<vmem>>, vector<8x8xf32>,
    return
  }
}

</mosaic_0001>

<bundles_post_ra>
// kernel: forward.1
= control target key start
LH: loop header
LB: loop body
LE: loop exit
PB: predicated region body
PF: predicated region fallthrough
CT: control target
= control target key end

     0   :  { %v338_v0 = vmov 0.0   ;;  %vm339_vm0 = vmmov 0   ;;  %vm106_vm1 = vcmask 130048   ;;  %vm56_vm2 = vcmask 261120   ;;  %s341_s24 = smov 32   ;;  %s342_s27 = smov 96   ;;  %s441_s4 = inlined_call_operand.vmem [shape: bf16[32,128], index: 4, kind: input, shape index: {}]   ;;  %s442_s3 = inlined_call_operand.vmem [shape: bf16[16,128], index: 3, kind: input, shape index: {}]   ;;  %s443_s0 = inlined_call_operand.vmem [shape: bf16[8,16], index: 0, kind: input, shape index: {}]   ;;  %s444_s1 = inlined_call_operand.vmem [shape: f32[1,8,32], index: 1, kind: input, shape index: {}, may-alias: {1,9}]   ;;  %s445_s5 = inlined_call_operand.vmem [shape: f32[1,128], index: 5, kind: input, shape index: {}]   ;;  %s446_s2 = inlined_call_operand.vmem [shape: f32[1,8,32], index: 2, kind: input, shape index: {}, may-alias: {2,10}]   ;;  %s447_s6 = inlined_call_operand.vmem [shape: bf16[32,8], index: 6, kind: input, shape index: {}]   ;;  %s448_s9 = inlined_call_operand.vmem [shape: f32[1,8,32], index: 9, kind: output, shape index: {1}, may-alias: {1,9}]   ;;  %s449_s10 = inlined_call_operand.vmem [shape: f32[1,8,32], index: 10, kind: output, shape index: {2}, may-alias: {2,10}]   ;;  %s450_s7 = inlined_call_operand.vmem [shape: f32[1,8], index: 7, kind: input, shape index: {}]   ;;  %s451_s8 = inlined_call_operand.vmem [shape: f32[8,8], index: 8, kind: output, shape index: {0}]  }
   0x1   :  { %298 = vmatprep.subr.bf16.mxu0 %v338_v0  ;;  %v325_v1 = vld [vmem:[%s441_s4] sm:$0xff]   ;;  %306 = vmatprep.subr.bf16.mxu1 %v338_v0  ;;  %v327_v3 = vld [vmem:[%s441_s4 + $0x8] sm:$0xff]   ;;  %vm265_vm3 = vcmask 64512  }
   0x2   :  { %v326_v2 = vld [vmem:[%s442_s3] sm:$0xff]   ;;  %308 = vmatprep.mubr.msk.bf16.mxu1 %vm339_vm0, %v338_v0  ;;  %302 = vmatprep.mubr.msk.bf16.mxu0 %vm339_vm0, %v338_v0  ;;  %v329_v31 = vld [vmem:[%s447_s6 + $0x8] sm:$0xff]  }
   0x3   :  { %299 = vmatpush3.bf16.msra.mxu0 %v325_v1  ;;  %307 = vmatpush3.bf16.msra.mxu1 %v326_v2  ;;  %v33_v4 = vld [vmem:[%s443_s0] sm:$0xf]  ;;  %s340_s0 = smov 64  }
   0x4   :  { %300 = vmatprep.subr.bf16.mxu0 %v338_v0  ;;  %v41_v5 = vld [vmem:[%s444_s1] sm:$0xff]  ;;  %312 = vmatprep.subr.bf16.mxu1 %v338_v0 }
   0x5   :  { %v43_v6 = vpack.c.bf16 %v41_v5, %v41_v5  ;;  %v284_v10 = vld [vmem:[%s445_s5] ss:$0 sm:$0xff] }
   0x6   :  { %309 = vmatmul.mubr.msk.bf16.vlgmr.msra.gmra.mrb[0].mxu1 %vm106_vm1, %v33_v4  ;;  %v42_v19 = vld [vmem:[%s446_s2] sm:$0xff] }
   0x7   :  { %301 = vmatpush3.bf16.msra.mxu0 %v327_v3  ;;  %316 = vmatprep.mubr.msk.bf16.mxu1 %vm339_vm0, %v338_v0  ;;  %v328_v30 = vld [vmem:[%s447_s6] sm:$0xff]  }
   0x8   :  { %313 = vmatpush3.bf16.msra.mxu1 %v328_v30  ;;  %v286_v39 = vld [vmem:[%s450_s7] ss:$0 sm:$0xff] }
   0x9   :  { %314 = vmatprep.subr.bf16.mxu1 %v338_v0 }
   0xa   :  { %303 = vmatmul.mubr.msk.bf16.vlgmr.msra.gmra.mrb[0].mxu0 %vm56_vm2, %v43_v6 }
   0xc   :  { %315 = vmatpush3.bf16.msra.mxu1 %v329_v31 }
  0xd9   :  { %v144_v7 = vpop.f32.mrb[0].mxu1 }
  0xda   :  { %v310_v8 = vpop.f32.mrb[1].mxu1 }
  0xdb   :  { %v147_v9 = vpop.f32.mrb[2].mxu1 }
  0xdc   :  { %v311_v12 = vpop.f32.mrb[3].mxu1 }
  0xdd   :  { %v94_v11 = vpop.f32.mrb[0].mxu0 }
  0xde   :  { %v145_v13 = vadd.f32 %v144_v7, %v94_v11  ;;  %v304_v14 = vpop.f32.mrb[1].mxu0 }
  0xdf   :  { %v97_v15 = vpop.f32.mrb[2].mxu0 }
  0xe0   :  { %v156_v16 = vadd.f32 %v284_v10, %v145_v13  ;;  %v305_v17 = vpop.f32.mrb[3].mxu0 }
  0xe2   :  { %330 = vtanh.f32 %v156_v16  ;;  %v285_v20 = vmul.f32 -1.442695, %v156_v16 }
  0xe4   :  { %332 = vpow2.f32 %v285_v20 }
  0xec   :  { %v331_v18 = vpop.eup %330 }
  0xed   :  { %170 = vrot.lane.b32.xlu0 %v331_v18, %s340_s0 }
  0xee   :  { %v333_v21 = vpop.eup %332 }
  0xef   :  { %v160_v22 = vadd.f32 1.0, %v333_v21 }
  0xf1   :  { %165 = vrot.lane.b32.xlu0 %v42_v19, %s341_s24  ;;  %334 = vrcp.f32 %v160_v22 }
  0xfb   :  { %v335_v23 = vpop.eup %334 }
 0x15f   :  { %v171_v24 = vpop.permute.xlu0 %170 }
 0x160   :  { %v173_v25 = vmul.f32 %v335_v23, %v171_v24 }
 0x162   :  { %175 = vrot.lane.b32.xlu1 %v173_v25, %s341_s24 }
 0x163   :  { %v166_v26 = vpop.permute.xlu0 %165 }
 0x164   :  { %v168_v27 = vmul.f32 %v335_v23, %v166_v26 }
 0x1d4   :  { %v176_v28 = vpop.permute.xlu1 %175 }
 0x1d5   :  { %v178_v29 = vadd.f32 %v176_v28, %v168_v27 }
 0x1d7   :  { %336 = vtanh.f32 %v178_v29 }
 0x1e1   :  { %v337_v32 = vpop.eup %336 }
 0x1e2   :  { %181 = vrot.lane.b32.xlu1 %v337_v32, %s340_s0 }
 0x254   :  { %v182_v33 = vpop.permute.xlu1 %181 }
 0x255   :  { %v184_v34 = vmul.f32 %v335_v23, %v182_v33 }
 0x257   :  { %v195_v35 = vpack.c.bf16 %v184_v34, %v184_v34  ;;  %186 = vrot.lane.b32.xlu1 %v184_v34, %s341_s24 }
 0x259   :  { %208 = vrot.lane.b32.xlu0 %v195_v35, %s341_s24 }
 0x25d   :  { %191 = vrot.lane.b32.xlu0 %v178_v29, %s342_s27 }
 0x2c9   :  { %v187_v36 = vpop.permute.xlu1 %186 }
 0x2ca   :  { %189 = vst.msk [vmem:[%s448_s9] sm:$0xff] %vm56_vm2, %v187_v36 }
 0x2cb   :  { %v209_v37 = vpop.permute.xlu0 %208 }
 0x2cc   :  { %317 = vmatmul.mubr.msk.bf16.vlgmr.msra.gmra.mrb[4].mxu1 %vm56_vm2, %v209_v37 }
 0x2cf   :  { %v192_v38 = vpop.permute.xlu0 %191 }
 0x2d0   :  { %194 = vst.msk [vmem:[%s449_s10] sm:$0xff] %vm56_vm2, %v192_v38 }
 0x39f   :  { %v259_v40 = vpop.f32.mrb[4].mxu1 }
 0x3a0   :  { %v260_v41 = vadd.f32 %v286_v39, %v259_v40  ;;  %v318_v42 = vpop.f32.mrb[5].mxu1 }
 0x3a1   :  { %v262_v43 = vpop.f32.mrb[6].mxu1 }
 0x3a2   :  { %266 = vst.msk [vmem:[%s451_s8] sm:$0xff] %vm265_vm3, %v260_v41  ;;  %v319_v44 = vpop.f32.mrb[7].mxu1 }

</bundles_post_ra>
